<compile_context>
chip_gen: v7x
topology: tpu7x:2x2x1
jax: 0.10.0
libtpu: 0.0.40
codegen_flags: <defaults>
</compile_context>

<pallas_src>
import math

import jax
import jax.numpy as jnp
from jax.experimental import pallas as pl
from jax.experimental.pallas import tpu as pltpu


# ----------------------------------------------------------------------------
# Grid construction (JAX port of torch build_3d_grid; torch.meshgrid = 'ij').
# ----------------------------------------------------------------------------
def build_3d_grid(resolution):
    ranges = [jnp.linspace(0.0, 1.0, num=res, dtype=jnp.float32) for res in resolution]
    mesh = jnp.meshgrid(*ranges, indexing="ij")
    grid = jnp.stack(mesh, axis=-1)
    grid = grid.reshape(resolution[0], resolution[1], resolution[2], -1)
    grid = grid[None]                                     # (1, T, H, W, 3)
    return jnp.concatenate([grid, 1.0 - grid], axis=-1)   # (1, T, H, W, 6)


# ----------------------------------------------------------------------------
# Small helpers.
# ----------------------------------------------------------------------------
def _round_up(x, m):
    return ((x + m - 1) // m) * m


def _sublane_multiple(itemsize):
    # Sublane packing unit: 8 for 4-byte, 16 for 2-byte, 32 for 1-byte dtypes.
    return max(8, 32 // max(int(itemsize), 1))


def _split_hi_lo_bf16(x):
    """Split f32 into bf16 hi/lo with hi + lo ~= x (relative error ~2^-17)."""
    hi = x.astype(jnp.bfloat16)
    lo = (x - hi.astype(jnp.float32)).astype(jnp.bfloat16)
    return hi, lo


def _choose_lanes(m_total, channels, target_lanes=512, max_lanes=4096):
    """Lane width L for the fused layout: multiple of both C and 128 dividing
    M = N*C.  Returns None when no such width exists (-> fallback path)."""
    base = channels * 128 // math.gcd(channels, 128)      # lcm(C, 128)
    if base > max_lanes or base > m_total or m_total % base != 0:
        return None
    lanes = base
    while lanes < target_lanes and 2 * lanes <= max_lanes and m_total % (2 * lanes) == 0:
        lanes *= 2
    return lanes


def _choose_rows(R, B, L, x_itemsize, J, *, budget_bytes=24 << 20,
                 target_block_bytes=2 << 20, min_steps=8):
    """Row-tile S for the fused kernel.  Accounts for sublane/lane padding,
    keeps the largest buffer at ~2 MiB and keeps >= min_steps grid steps when
    the problem is large enough (DMA/compute overlap + both v7x TensorCores)."""
    # S is shared by the f32/x blocks and the bf16 grid blocks -> use the
    # strictest sublane unit (>= 16 because the grid hi/lo operands are bf16).
    sub = max(_sublane_multiple(x_itemsize), 16)
    if R <= sub:
        return R                                   # full dim (always legal)
    per_row = (4 * B * L * x_itemsize              # x in + out, double-buffered
               + 8 * _round_up(J, 128)             # grid hi/lo blocks (bf16), dbl-buf
               + 4 * L)                            # f32 pos temporary
    fixed = (4 * _round_up(J, 16) * L * 2          # E hi + lo (resident, counted x2)
             + 2 * 8 * L * 4                       # tiled bias row (sublane padded)
             + (2 << 20))                          # slack for compiler temporaries
    avail = max(budget_bytes - fixed, per_row * sub)
    s = min(avail // per_row,
            max(target_block_bytes // max(B * L * x_itemsize, 1), sub),
            max(-(-R // min_steps), sub),          # cap so grid has >= min_steps
            R)
    s = max(sub, (s // sub) * sub)
    if s >= R:                                     # keep >= 2 steps when possible
        s = max(sub, ((R + 1) // 2 // sub) * sub)
    return min(s, R)


# ----------------------------------------------------------------------------
# Fused kernel: per row-tile, compute pos = grid_rows @ E + b on the MXU
# (bf16 hi/lo pairs, f32 accumulation) and stream the broadcast add.
# ----------------------------------------------------------------------------
def _fused_kernel(gh_ref, gl_ref, eh_ref, el_ref, b_ref, x_ref, o_ref):
    gh = gh_ref[...]                                # (S, 6G) bf16
    gl = gl_ref[...]
    eh = eh_ref[...]                                # (6G, L) bf16
    el = el_ref[...]
    pos = (jnp.dot(gh, eh, preferred_element_type=jnp.float32)
           + jnp.dot(gh, el, preferred_element_type=jnp.float32)
           + jnp.dot(gl, eh, preferred_element_type=jnp.float32)
           + jnp.dot(gl, el, preferred_element_type=jnp.float32)
           + b_ref[...])                            # (S, L) f32
    o_ref[...] = (x_ref[...].astype(jnp.float32) + pos[None, :, :]).astype(o_ref.dtype)


def _fused_embed_add(x_flat, grid_flat, weight, bias, L, *, donate_inputs=False):
    B, M = x_flat.shape
    K, C = weight.shape                              # K = 6
    G = L // C
    J = G * K
    R = M // L
    itemsize = jnp.dtype(x_flat.dtype).itemsize

    # Host-side constant prep (tiny arrays; in a module this happens once).
    grid2 = grid_flat.reshape(R, J)                  # grid2[r, g*K+k] = grid[r*G+g, k]
    eye_g = jnp.eye(G, dtype=jnp.float32)
    e_mat = jnp.einsum("gh,kc->gkhc", eye_g, weight).reshape(J, L)   # block-diag W
    b_tiled = jnp.tile(bias, G).reshape(1, L)        # b_tiled[g*C+c] = b[c]

    g_hi, g_lo = _split_hi_lo_bf16(grid2)
    e_hi, e_lo = _split_hi_lo_bf16(e_mat)

    x3 = x_flat.reshape(B, R, L)
    S = _choose_rows(R, B, L, itemsize, J)
    n_steps = pl.cdiv(R, S)

    cost = pl.CostEstimate(
        flops=2 * B * M + 8 * R * J * L,
        transcendentals=0,
        bytes_accessed=2 * B * M * itemsize + 4 * R * J + 4 * J * L + 4 * L,
    )

    out = pl.pallas_call(
        _fused_kernel,
        out_shape=jax.ShapeDtypeStruct((B, R, L), x_flat.dtype),
        grid=(n_steps,),
        in_specs=[
            pl.BlockSpec((S, J), lambda i: (i, 0)),        # grid rows, hi
            pl.BlockSpec((S, J), lambda i: (i, 0)),        # grid rows, lo
            pl.BlockSpec((J, L), lambda i: (0, 0)),        # E hi (resident)
            pl.BlockSpec((J, L), lambda i: (0, 0)),        # E lo (resident)
            pl.BlockSpec((1, L), lambda i: (0, 0)),        # tiled bias (resident)
            pl.BlockSpec((B, S, L), lambda i: (0, i, 0)),  # inputs tile (full batch)
        ],
        out_specs=pl.BlockSpec((B, S, L), lambda i: (0, i, 0)),
        compiler_params=pltpu.CompilerParams(
            dimension_semantics=("parallel",),
            vmem_limit_bytes=32 * 1024 * 1024,
        ),
        cost_estimate=cost,
        input_output_aliases=({5: 0} if donate_inputs else {}),
    )(g_hi, g_lo, e_hi, e_lo, b_tiled, x3)
    return out.reshape(B, M)


# ----------------------------------------------------------------------------
# Fallback: projection in XLA (exact f32), lane-dense streaming add in Pallas.
# Used only when no lane width with C | L and L | N*C exists.
# ----------------------------------------------------------------------------
def _unfused_kernel(pos_ref, x_ref, o_ref):
    o_ref[...] = (x_ref[...].astype(jnp.float32) + pos_ref[...]).astype(o_ref.dtype)


def _choose_flat_tile(M, B, itemsize, *, budget_bytes=24 << 20,
                      target_block_bytes=2 << 20, min_steps=8):
    if M <= 128:
        return M
    sub = _sublane_multiple(itemsize)
    b_pad = _round_up(B, sub)                       # sublane padding for small B
    per_tm = 4 * b_pad * itemsize + 2 * 8 * 4       # x in+out (dbl-buf) + pos (8 sublanes)
    tm = min(max(budget_bytes // per_tm, 128),
             max(target_block_bytes // max(b_pad * itemsize, 1), 128),
             max(-(-M // min_steps), 128),
             M)
    tm = max(128, (tm // 128) * 128)
    if tm >= M:
        tm = max(128, ((M // 2) // 128) * 128)      # keep >= 2 grid steps
    return min(tm, M)


def _unfused_add(x_flat, pos_flat, *, donate_inputs=False):
    B, M = x_flat.shape
    itemsize = jnp.dtype(x_flat.dtype).itemsize
    tm = _choose_flat_tile(M, B, itemsize)
    n_steps = pl.cdiv(M, tm)
    cost = pl.CostEstimate(flops=B * M, transcendentals=0,
                           bytes_accessed=2 * B * M * itemsize + M * 4)
    return pl.pallas_call(
        _unfused_kernel,
        out_shape=jax.ShapeDtypeStruct((B, M), x_flat.dtype),
        grid=(n_steps,),
        in_specs=[
            pl.BlockSpec((1, tm), lambda i: (0, i)),   # pos tile (shared by all B)
            pl.BlockSpec((B, tm), lambda i: (0, i)),   # inputs tile
        ],
        out_specs=pl.BlockSpec((B, tm), lambda i: (0, i)),
        compiler_params=pltpu.CompilerParams(
            dimension_semantics=("parallel",),
            vmem_limit_bytes=32 * 1024 * 1024,
        ),
        cost_estimate=cost,
        input_output_aliases=({1: 0} if donate_inputs else {}),
    )(pos_flat, x_flat)


# ----------------------------------------------------------------------------
# Public entry point.
# ----------------------------------------------------------------------------
def soft_position_embed_3d(inputs, grid, weight, bias, *, donate_inputs=False):
    """inputs: (B, T, H, W, C), grid: (1, T, H, W, 6),
    weight: (6, C) (= torch Linear weight transposed), bias: (C,)."""
    B, T, H, W, C = inputs.shape
    N = T * H * W
    M = N * C

    grid_flat = grid.reshape(N, grid.shape[-1]).astype(jnp.float32)
    weight = weight.astype(jnp.float32)
    bias = bias.astype(jnp.float32)
    x_flat = inputs.reshape(B, M)

    L = _choose_lanes(M, C)
    if L is not None:
        out = _fused_embed_add(x_flat, grid_flat, weight, bias, L,
                               donate_inputs=donate_inputs)
    else:
        # Tiny 6xC projection in XLA (exact f32), lane-dense Pallas add.
        pos = (jnp.dot(grid_flat, weight, precision=jax.lax.Precision.HIGHEST)
               + bias).reshape(1, M)
        out = _unfused_add(x_flat, pos, donate_inputs=donate_inputs)
    return out.reshape(B, T, H, W, C)


if __name__ == "__main__":
    hidden_size = 32
    resolution = (8, 16, 16)           # (T, H, W) -> N = 2048, M = N*C = 65536
    batch = 2

    key = jax.random.PRNGKey(0)
    k_x, k_w, k_b = jax.random.split(key, 3)

    # nn.Linear(6, hidden_size): weight (hidden, 6), bias (hidden,).
    bound = 1.0 / jnp.sqrt(6.0)
    w_torch_layout = jax.random.uniform(k_w, (hidden_size, 6), jnp.float32,
                                        minval=-bound, maxval=bound)
    bias = jax.random.uniform(k_b, (hidden_size,), jnp.float32,
                              minval=-bound, maxval=bound)
    weight = w_torch_layout.T          # (6, hidden) for right-multiplication

    inputs = jax.random.normal(
        k_x, (batch, *resolution, hidden_size), dtype=jnp.float32)
    grid = build_3d_grid(resolution)   # (1, T, H, W, 6)

    fn = jax.jit(soft_position_embed_3d)
    out = jax.block_until_ready(fn(inputs, grid, weight, bias))

    # Pure-JAX reference (exact f32 math, same semantics as the torch module).
    pos_ref = jnp.einsum("othwk,kc->othwc", grid, weight,
                         precision=jax.lax.Precision.HIGHEST) + bias
    ref = inputs + pos_ref
    # The fused kernel feeds the 6->C projection through the bf16-native MXU as
    # hi/lo split operands; the only loss vs exact f32 is the ~2^-17 split
    # residual (<2e-5 absolute here), far inside this tolerance.
    assert jnp.allclose(out, ref, atol=1e-4, rtol=1e-4), "mismatch vs reference"

    print("KERNEL_OK")
</pallas_src>

<mosaic_0001>
module attributes {stable_mosaic.version = 11 : i64} {
  func.func @_fused_kernel(%arg0: i32, %arg1: memref<16x96xbf16, #tpu.memory_space<vmem>>, %arg2: memref<16x96xbf16, #tpu.memory_space<vmem>>, %arg3: memref<96x512xbf16, #tpu.memory_space<vmem>>, %arg4: memref<96x512xbf16, #tpu.memory_space<vmem>>, %arg5: memref<1x512xf32, #tpu.memory_space<vmem>>, %arg6: memref<2x16x512xf32, #tpu.memory_space<vmem>>, %arg7: memref<2x16x512xf32, #tpu.memory_space<vmem>>) attributes {dimension_semantics = [#tpu.dimension_semantics<parallel>], iteration_bounds = array<i64: 8>, scalar_prefetch = 0 : i64, scratch_operands = 0 : i64, tpu.core_type = #tpu.core_type<tc>, window_params = [{transform_indices = @transform_0, window_bounds = array<i64: 16, 96>}, {transform_indices = @transform_1, window_bounds = array<i64: 16, 96>}, {pipeline_mode = #tpu.pipeline_mode<synchronous>, transform_indices = @transform_2, window_bounds = array<i64: 96, 512>}, {pipeline_mode = #tpu.pipeline_mode<synchronous>, transform_indices = @transform_3, window_bounds = array<i64: 96, 512>}, {pipeline_mode = #tpu.pipeline_mode<synchronous>, transform_indices = @transform_4, window_bounds = array<i64: 1, 512>}, {transform_indices = @transform_5, window_bounds = array<i64: 2, 16, 512>}, {transform_indices = @transform_6, window_bounds = array<i64: 2, 16, 512>}]} {
    %c0 = arith.constant 0 : index
    %c0_0 = arith.constant 0 : index
    %0 = vector.load %arg1[%c0, %c0_0] : memref<16x96xbf16, #tpu.memory_space<vmem>>, vector<16x96xbf16>
    %c0_1 = arith.constant 0 : index
    %c0_2 = arith.constant 0 : index
    %1 = vector.load %arg2[%c0_1, %c0_2] : memref<16x96xbf16, #tpu.memory_space<vmem>>, vector<16x96xbf16>
    %c0_3 = arith.constant 0 : index
    %c0_4 = arith.constant 0 : index
    %2 = vector.load %arg3[%c0_3, %c0_4] : memref<96x512xbf16, #tpu.memory_space<vmem>>, vector<96x512xbf16>
    %c0_5 = arith.constant 0 : index
    %c0_6 = arith.constant 0 : index
    %3 = vector.load %arg4[%c0_5, %c0_6] : memref<96x512xbf16, #tpu.memory_space<vmem>>, vector<96x512xbf16>
    %cst = arith.constant dense<0.000000e+00> : vector<16x512xf32>
    %4 = tpu.matmul %0, %2, %cst {dimension_numbers = #tpu.dot_dimension_numbers<[1], [0], [0], [1], [0, 0, 1, 1], [], []>} : vector<16x96xbf16>, vector<96x512xbf16>, vector<16x512xf32> -> vector<16x512xf32>
    %cst_7 = arith.constant dense<0.000000e+00> : vector<16x512xf32>
    %5 = tpu.matmul %0, %3, %cst_7 {dimension_numbers = #tpu.dot_dimension_numbers<[1], [0], [0], [1], [0, 0, 1, 1], [], []>} : vector<16x96xbf16>, vector<96x512xbf16>, vector<16x512xf32> -> vector<16x512xf32>
    %6 = arith.addf %4, %5 : vector<16x512xf32>
    %cst_8 = arith.constant dense<0.000000e+00> : vector<16x512xf32>
    %7 = tpu.matmul %1, %2, %cst_8 {dimension_numbers = #tpu.dot_dimension_numbers<[1], [0], [0], [1], [0, 0, 1, 1], [], []>} : vector<16x96xbf16>, vector<96x512xbf16>, vector<16x512xf32> -> vector<16x512xf32>
    %8 = arith.addf %6, %7 : vector<16x512xf32>
    %cst_9 = arith.constant dense<0.000000e+00> : vector<16x512xf32>
    %9 = tpu.matmul %1, %3, %cst_9 {dimension_numbers = #tpu.dot_dimension_numbers<[1], [0], [0], [1], [0, 0, 1, 1], [], []>} : vector<16x96xbf16>, vector<96x512xbf16>, vector<16x512xf32> -> vector<16x512xf32>
    %10 = arith.addf %8, %9 : vector<16x512xf32>
    %c0_10 = arith.constant 0 : index
    %c0_11 = arith.constant 0 : index
    %11 = vector.load %arg5[%c0_10, %c0_11] : memref<1x512xf32, #tpu.memory_space<vmem>>, vector<1x512xf32>
    %12 = vector.broadcast %11 : vector<1x512xf32> to vector<16x512xf32>
    %13 = arith.addf %10, %12 : vector<16x512xf32>
    %c0_12 = arith.constant 0 : index
    %c0_13 = arith.constant 0 : index
    %c0_14 = arith.constant 0 : index
    %14 = vector.load %arg6[%c0_12, %c0_13, %c0_14] : memref<2x16x512xf32, #tpu.memory_space<vmem>>, vector<2x16x512xf32>
    %15 = vector.shape_cast %13 : vector<16x512xf32> to vector<1x16x512xf32>
    %16 = vector.broadcast %15 : vector<1x16x512xf32> to vector<2x16x512xf32>
    %17 = arith.addf %14, %16 : vector<2x16x512xf32>
    %c0_15 = arith.constant 0 : index
    %c0_16 = arith.constant 0 : index
    %c0_17 = arith.constant 0 : index
    %18 = vector.load %arg7[%c0_15, %c0_16, %c0_17] : memref<2x16x512xf32, #tpu.memory_space<vmem>>, vector<2x16x512xf32>
    tpu.vector_store %arg7[%c0_15, %c0_16, %c0_17], %17 {strides = array<i32>} : memref<2x16x512xf32, #tpu.memory_space<vmem>>, vector<2x16x512xf32>,
    return
  }
  func.func @transform_0(%arg0: i32) -> (i32, i32) {
    %c0_i32 = arith.constant 0 : i32
    %c0_i32_0 = arith.constant 0 : i32
    return %arg0, %c0_i32 : i32, i32
  }
  func.func @transform_1(%arg0: i32) -> (i32, i32) {
    %c0_i32 = arith.constant 0 : i32
    %c0_i32_0 = arith.constant 0 : i32
    return %arg0, %c0_i32 : i32, i32
  }
  func.func @transform_2(%arg0: i32) -> (i32, i32) {
    %c0_i32 = arith.constant 0 : i32
    %c0_i32_0 = arith.constant 0 : i32
    %c0_i32_1 = arith.constant 0 : i32
    return %c0_i32, %c0_i32_0 : i32, i32
  }
  func.func @transform_3(%arg0: i32) -> (i32, i32) {
    %c0_i32 = arith.constant 0 : i32
    %c0_i32_0 = arith.constant 0 : i32
    %c0_i32_1 = arith.constant 0 : i32
    return %c0_i32, %c0_i32_0 : i32, i32
  }
  func.func @transform_4(%arg0: i32) -> (i32, i32) {
    %c0_i32 = arith.constant 0 : i32
    %c0_i32_0 = arith.constant 0 : i32
    %c0_i32_1 = arith.constant 0 : i32
    return %c0_i32, %c0_i32_0 : i32, i32
  }
  func.func @transform_5(%arg0: i32) -> (i32, i32, i32) {
    %c0_i32 = arith.constant 0 : i32
    %c0_i32_0 = arith.constant 0 : i32
    %c0_i32_1 = arith.constant 0 : i32
    return %c0_i32, %arg0, %c0_i32_0 : i32, i32, i32
  }
  func.func @transform_6(%arg0: i32) -> (i32, i32, i32) {
    %c0_i32 = arith.constant 0 : i32
    %c0_i32_0 = arith.constant 0 : i32
    %c0_i32_1 = arith.constant 0 : i32
    return %c0_i32, %arg0, %c0_i32_0 : i32, i32, i32
  }
}

</mosaic_0001>

<bundles_post_ra>
// kernel: tile.9
= control target key start
LH: loop header
LB: loop body
LE: loop exit
PB: predicated region body
PF: predicated region fallthrough
CT: control target
= control target key end

     0   :  { %s57_s8 = smov 96   ;;  %vm3_vm0 = vcmask 261120   ;;  %s59_s15 = smov 64   ;;  %vm9_vm1 = vcmask 1048320   ;;  %vm15_vm2 = vcmask 785920   ;;  %vm21_vm3 = vcmask 523520   ;;  %s94_s0 = inlined_call_operand.vmem [shape: f32[16,32], index: 0, kind: input, shape index: {}]   ;;  %s95_s1 = inlined_call_operand.vmem [shape: f32[1,512], index: 1, kind: output, shape index: {}]  }
   0x1   :  { %v48_v0 = vld [vmem:[%s94_s0 + $0x3] ss:$4 sm:$0xf]   ;;  %v49_v1 = vld [vmem:[%s94_s0 + $0x2] ss:$4 sm:$0xf]  }
   0x2   :  { %7 = vrot.lane.b32.xlu0 %v48_v0, %s57_s8  ;;  %v50_v2 = vld [vmem:[%s94_s0 + $0x1] ss:$4 sm:$0xf]   ;;  %v2_v3 = vld [vmem:[%s94_s0] ss:$4 sm:$0xf]  }
   0x3   :  { %s58_s0 = smov 32   ;;  %4 = vst.msk [vmem:[#allocation0] ss:$8 sm:$0xf] %vm3_vm0, %v2_v3  }
   0x4   :  { %19 = vrot.lane.b32.xlu1 %v50_v2, %s58_s0 }
   0x6   :  { %13 = vrot.lane.b32.xlu0 %v49_v1, %s59_s15 }
  0x74   :  { %v8_v4 = vpop.permute.xlu0 %7  }
  0x75   :  { %10 = vst.msk [vmem:[#allocation0] ss:$8 sm:$0xf] %vm9_vm1, %v8_v4  }
  0x76   :  { %v20_v5 = vpop.permute.xlu1 %19  }
  0x78   :  { %v14_v6 = vpop.permute.xlu0 %13  }
  0x79   :  { %16 = vst.msk [vmem:[#allocation0] ss:$8 sm:$0xf] %vm15_vm2, %v14_v6  }
  0x7a   :  { %22 = vst.msk [vmem:[#allocation0] ss:$8 sm:$0xf] %vm21_vm3, %v20_v5  }
  0x81   :  { %v26_v7 = vld [vmem:[#allocation0] sm:$0x1]  ;;  %v30_v8 = vld [vmem:[#allocation0 + $0x8] sm:$0x1]  ;;  %v35_v9 = vld [vmem:[#allocation0 + $0x10] sm:$0x1] }
  0x82   :  { %28 = vst [vmem:[%s95_s1] sm:$0x1] %v26_v7  ;;  %51 = vst [vmem:[%s95_s1 + $0x1] sm:$0x1] %v30_v8  ;;  %v41_v10 = vld [vmem:[#allocation0 + $0x18] sm:$0x1] }
  0x83   :  { %52 = vst [vmem:[%s95_s1 + $0x2] sm:$0x1] %v35_v9  ;;  %53 = vst [vmem:[%s95_s1 + $0x3] sm:$0x1] %v41_v10 }

// kernel: tile.8
= control target key start
LH: loop header
LB: loop body
LE: loop exit
PB: predicated region body
PF: predicated region fallthrough
CT: control target
= control target key end

     0   :  { %2 = vsyncpa [#allocation1], 0  ;;  %s47_s6 = smov [#allocation0]   ;;  %s76_s0 = inlined_call_operand.hbm [shape: f32[32], index: 0, kind: input, shape index: {}]   ;;  %s77_s1 = inlined_call_operand.vmem [shape: f32[16,32], index: 1, kind: output, shape index: {}]  }
   0x1   :  { %s9_s7 = sshll.u32 %s47_s6, 4  ;;  %s23_s10 = scalar_lea.hbm %s76_s0, 16  ;;  %s10_s7 = int_to_ptr.vmem [resolvable:$true] %s9_s7 }
   0x2   :  { %p24_p0 = scmp.ne.s32.totalorder %s76_s0, %s23_s10  ;;  %p27_p1 = scmp.lt.u32.totalorder %s23_s10, %s76_s0 }
   0x4   :  { %p29_p2 = pnand %p27_p1, %p24_p0 }
   0x6   :  { %32 = shalt.err (!%p29_p2)
}
   0x7   :  { %s33_s15 = scalar_lea.vmem %s10_s7, 16  ;;  %s37_s16 = scalar_lea.vmem %s10_s7, 32 }
   0x8   :  { %p34_p3 = scmp.ne.s32.totalorder %s10_s7, %s33_s15  ;;  %p38_p4 = scmp.lt.s32.totalorder %s10_s7, %s10_s7 }
   0x9   :  { %p39_p5 = scmp.lt.s32.totalorder %s37_s16, %s33_s15 }
   0xb   :  { %p40_p6 = por %p39_p5, %p38_p4 }
   0xd   :  { %p41_p7 = pnand %p40_p6, %p34_p3 }
   0xf   :  { %44 = shalt.err (!%p41_p7)
}
  0x10   :  { %12 = dma.hbm_to_vmem [thread:$0]  %s76_s0, 16, %s10_s7, [#allocation1]  }
  0x11   :  { %45 = dma.done.wait [#allocation1], 16  }
  0x12   :  { %46 = vsyncadd [#allocation1], 4294967280  ;;  %v16_v0 = vld [vmem:[#allocation0] ss:$0 sm:$0xff] }
  0x13   :  { %17 = vst [vmem:[%s77_s1] sm:$0xff] %v16_v0  ;;  %21 = vst [vmem:[%s77_s1 + $0x8] sm:$0xff] %v16_v0 }
  0x14   :  { %20 = vsyncpa [#allocation1], 1 }

// kernel: soft_position_embed_3d.1
= control target key start
LH: loop header
LB: loop body
LE: loop exit
PB: predicated region body
PF: predicated region fallthrough
CT: control target
= control target key end

     0   :  { %s1495_s21 = smov 0   ;;  %s1497_s22 = smov 0   ;;  %s1898_s0 = inlined_call_operand.vmem [shape: bf16[128,96], index: 0, kind: input, shape index: {}]   ;;  %s1899_s1 = inlined_call_operand.vmem [shape: bf16[128,96], index: 1, kind: input, shape index: {}]   ;;  %s1900_s2 = inlined_call_operand.vmem [shape: bf16[96,512], index: 2, kind: input, shape index: {}]   ;;  %s1901_s3 = inlined_call_operand.vmem [shape: bf16[96,512], index: 3, kind: input, shape index: {}]   ;;  %s1902_s4 = inlined_call_operand.vmem [shape: f32[1,512], index: 4, kind: input, shape index: {}]   ;;  %s1903_s5 = inlined_call_operand.vmem [shape: f32[2,128,512], index: 5, kind: input, shape index: {}]   ;;  %s1904_s6 = inlined_call_operand.vmem [shape: f32[2,128,512], index: 6, kind: output, shape index: {}]  }
   0x1   :  { %s1499_s23 = smov 0  }
   0x2 LB: > { %s1511_s24 = sadd.s32 4294967295, %s1457_s23   ;;  %s1514_s25 = sadd.s32 1, %s1457_s23   ;;  %s1457_s23 = sphi %s1499_s23, %s1908_s23   ;;  %s1453_s22 = sphi %s1497_s22, %s1907_s22   ;;  %s1449_s21 = sphi %s1495_s21, %s1906_s21  }
   0x3   : > { %s135_s26 = ssub.s32 %s1457_s23, %s1514_s25  ;;  %s138_s27 = sadd.s32 1, %s1453_s22 }
   0x4   : > { %p136_p0 = scmp.eq.s32.totalorder %s135_s26, 0  ;;  %p145_p1 = scmp.ne.s32.totalorder %s1453_s22, %s1449_s21 }
   0x5   : > { %p146_p2 = scmp.eq.s32.totalorder %s1457_s23, 0  ;;  %p175_p3 = scmp.eq.s32.totalorder %s1511_s24, 7 }
   0x6   : > { %s1524_s28 = scalar_select %p136_p0, %s1453_s22, %s138_s27  }
   0x7   : > { %p147_p4 = por %p146_p2, %p145_p1  ;;  %p1526_p5 = por %p175_p3, %p145_p1 }
   0x8   : > { %p1232_p6 = scmp.ge.s32.totalorder %s1457_s23, 8 }
   0xa   : > { %206 = sbr.rel (%p1232_p6) target bundleno = 29 (0x1d), region = 28 }
  0x11   : > { %227 = sbr.rel (!%p147_p4) target bundleno = 29 (0x1d), region = 40  ;;  %s229_s30 = sand.u32 (%p147_p4), 1, %s1453_s22  }
  0x12   : > { %s1309_s7 = sshll.u32 (%p147_p4), %s1457_s23, 6  ;;  %s1233_s8 = sshll.u32 (%p147_p4), %s229_s30, 7 }
  0x13   : > { %s1536_s11 = scalar_lea.vmem (%p147_p4), %s1903_s5, %s1309_s7  ;;  %s231_s12 = scalar_lea.vmem (%p147_p4), [#allocation2], %s1233_s8 }
  0x14   : > { %v248_v0 = vld [vmem:[%s1536_s11] sm:$0xff] (%p147_p4)  ;;  %v250_v1 = vld [vmem:[%s1536_s11 + $0x8] sm:$0xff] (%p147_p4)  ;;  %v252_v2 = vld [vmem:[%s1536_s11 + $0x10] sm:$0xff] (%p147_p4) }
  0x15   : > { %249 = vst [vmem:[%s231_s12] sm:$0xff] (%p147_p4), %v248_v0  ;;  %251 = vst [vmem:[%s231_s12 + $0x8] sm:$0xff] (%p147_p4), %v250_v1  ;;  %v254_v3 = vld [vmem:[%s1536_s11 + $0x18] sm:$0xff] (%p147_p4)  ;;  %v256_v4 = vld [vmem:[%s1536_s11 + $0x20] sm:$0xff] (%p147_p4) }
  0x16   : > { %253 = vst [vmem:[%s231_s12 + $0x10] sm:$0xff] (%p147_p4), %v252_v2  ;;  %v258_v5 = vld [vmem:[%s1536_s11 + $0x28] sm:$0xff] (%p147_p4)  ;;  %255 = vst [vmem:[%s231_s12 + $0x18] sm:$0xff] (%p147_p4), %v254_v3  ;;  %v260_v6 = vld [vmem:[%s1536_s11 + $0x30] sm:$0xff] (%p147_p4) }
  0x17   : > { %257 = vst [vmem:[%s231_s12 + $0x20] sm:$0xff] (%p147_p4), %v256_v4  ;;  %259 = vst [vmem:[%s231_s12 + $0x28] sm:$0xff] (%p147_p4), %v258_v5  ;;  %v262_v7 = vld [vmem:[%s1536_s11 + $0x38] sm:$0xff] (%p147_p4)  ;;  %v264_v8 = vld [vmem:[%s1536_s11 + $0x200] sm:$0xff] (%p147_p4) }
  0x18   : > { %261 = vst [vmem:[%s231_s12 + $0x30] sm:$0xff] %v260_v6  ;;  %263 = vst [vmem:[%s231_s12 + $0x38] sm:$0xff] %v262_v7  ;;  %v266_v9 = vld [vmem:[%s1536_s11 + $0x208] sm:$0xff]  ;;  %v268_v10 = vld [vmem:[%s1536_s11 + $0x210] sm:$0xff] }
  0x19   : > { %265 = vst [vmem:[%s231_s12 + $0x40] sm:$0xff] %v264_v8  ;;  %v270_v11 = vld [vmem:[%s1536_s11 + $0x218] sm:$0xff]  ;;  %267 = vst [vmem:[%s231_s12 + $0x48] sm:$0xff] %v266_v9  ;;  %v272_v12 = vld [vmem:[%s1536_s11 + $0x220] sm:$0xff] }
  0x1a   : > { %269 = vst [vmem:[%s231_s12 + $0x50] sm:$0xff] %v268_v10  ;;  %271 = vst [vmem:[%s231_s12 + $0x58] sm:$0xff] %v270_v11  ;;  %v274_v13 = vld [vmem:[%s1536_s11 + $0x228] sm:$0xff]  ;;  %v276_v14 = vld [vmem:[%s1536_s11 + $0x230] sm:$0xff] }
  0x1b   : > { %273 = vst [vmem:[%s231_s12 + $0x60] sm:$0xff] %v272_v12  ;;  %275 = vst [vmem:[%s231_s12 + $0x68] sm:$0xff] %v274_v13  ;;  %v278_v15 = vld [vmem:[%s1536_s11 + $0x238] sm:$0xff] }
  0x1c   : > { %277 = vst [vmem:[%s231_s12 + $0x70] sm:$0xff] %v276_v14  ;;  %279 = vst [vmem:[%s231_s12 + $0x78] sm:$0xff] %v278_v15 }
  0x1d PF: > { %p1237_p7 = scmp.ge.s32.totalorder %s1457_s23, 1  ;;  %p284_p8 = scmp.lt.s32.totalorder %s1457_s23, 9 }
  0x1f   : > { %p285_p9 = pnand %p1237_p7, %p284_p8 }
  0x20   : > { %v1559_v16 = vld [vmem:[%s1901_s3 + $0x4] ss:$16 sps:$4 sm:$0xff] (!%p285_p9)   ;;  %v1564_v17 = vld [vmem:[%s1901_s3 + $0xc] ss:$16 sps:$4 sm:$0xff] (!%p285_p9)   ;;  %v1459_v18 = vmov (!%p285_p9), 0   ;;  %s1240_s27 = sshll.u32 (!%p285_p9), %s1511_s24, 1  ;;  %v1015_v3 = vlaneseq (!%p285_p9) }
  0x21   : > { %288 = sbr.rel (%p285_p9) target bundleno = 363 (0x16b), region = 63  ;;  %557 = vmatprep.mubr.bf16.mxu0 (!%p285_p9), %v1459_v18  ;;  %600 = vmatprep.mubr.bf16.mxu1 (!%p285_p9), %v1459_v18  ;;  %v1572_v19 = vld [vmem:[%s1901_s3] ss:$16 sps:$4 sm:$0xff] (!%p285_p9)   ;;  %v1577_v20 = vld [vmem:[%s1901_s3 + $0x8] ss:$16 sps:$4 sm:$0xff] (!%p285_p9)   ;;  %p330_p10 = scmp.lt.s32.totalorder (!%p285_p9), %s1240_s27, 15 }
  0x22   : > { %525 = vmatprep.subr.bf16.mxu0 (!%p285_p9), %v1559_v16  ;;  %568 = vmatprep.subr.bf16.mxu1 (!%p285_p9), %v1564_v17  ;;  %v1583_v21 = vld [vmem:[%s1901_s3 + $0x24] ss:$16 sps:$4 sm:$0xff] (!%p285_p9)   ;;  %v1591_v22 = vld [vmem:[%s1901_s3 + $0x2c] ss:$16 sps:$4 sm:$0xff] (!%p285_p9)   ;;  %v1596_v23 = vld [vmem:[%s1901_s3 + $0x20] ss:$16 sps:$4 sm:$0xff] (!%p285_p9)  }
  0x23   : > { %526 = vmatpush1.bf16.msra.mxu0 (!%p285_p9), %v1572_v19  ;;  %569 = vmatpush1.bf16.msra.mxu1 (!%p285_p9), %v1577_v20  ;;  %v1602_v24 = vld [vmem:[%s1901_s3 + $0x28] ss:$16 sps:$4 sm:$0xff] (!%p285_p9)   ;;  %v1608_v25 = vld [vmem:[%s1901_s3 + $0x44] ss:$16 sps:$4 sm:$0xff] (!%p285_p9)   ;;  %v1613_v26 = vld [vmem:[%s1901_s3 + $0x4c] ss:$16 sps:$4 sm:$0xff] (!%p285_p9)  }
  0x24   : > { %527 = vmatprep.subr.bf16.mxu0 (!%p285_p9), %v1583_v21  ;;  %570 = vmatprep.subr.bf16.mxu1 (!%p285_p9), %v1591_v22  ;;  %v1618_v27 = vld [vmem:[%s1901_s3 + $0x40] ss:$16 sps:$4 sm:$0xff] (!%p285_p9)   ;;  %v1623_v28 = vld [vmem:[%s1901_s3 + $0x48] ss:$16 sps:$4 sm:$0xff] (!%p285_p9)   ;;  %v1630_v29 = vld [vmem:[%s1901_s3 + $0x64] ss:$16 sps:$4 sm:$0xff] (!%p285_p9)  }
  0x25   : > { %v1637_v30 = vld [vmem:[%s1901_s3 + $0x6c] ss:$16 sps:$4 sm:$0xff] (!%p285_p9)   ;;  %v1642_v31 = vld [vmem:[%s1901_s3 + $0x60] ss:$16 sps:$4 sm:$0xff] (!%p285_p9)   ;;  %v1649_v32 = vld [vmem:[%s1901_s3 + $0x68] ss:$16 sps:$4 sm:$0xff] (!%p285_p9)  }
  0x26   : > { %v1654_v33 = vld [vmem:[%s1901_s3 + $0x84] ss:$16 sps:$4 sm:$0xff] (!%p285_p9)   ;;  %v1661_v34 = vld [vmem:[%s1901_s3 + $0x8c] ss:$16 sps:$4 sm:$0xff] (!%p285_p9)   ;;  %v1666_v35 = vld [vmem:[%s1901_s3 + $0x80] ss:$16 sps:$4 sm:$0xff] (!%p285_p9)  }
  0x27   : > { %528 = vmatpush1.bf16.msra.mxu0 (!%p285_p9), %v1596_v23  ;;  %571 = vmatpush1.bf16.msra.mxu1 (!%p285_p9), %v1602_v24  ;;  %v1671_v36 = vld [vmem:[%s1901_s3 + $0x88] ss:$16 sps:$4 sm:$0xff] (!%p285_p9)   ;;  %v1678_v37 = vld [vmem:[%s1901_s3 + $0xa4] ss:$16 sps:$4 sm:$0xff] (!%p285_p9)   ;;  %v1685_v38 = vld [vmem:[%s1901_s3 + $0xac] ss:$16 sps:$4 sm:$0xff] (!%p285_p9)  }
  0x28   : > { %529 = vmatprep.subr.bf16.mxu0 %v1608_v25  ;;  %572 = vmatprep.subr.bf16.mxu1 %v1613_v26  ;;  %s1910_s27 = smov (!%p330_p10, %s1240_s27), 15  ;;  %v1693_v39 = vld [vmem:[%s1901_s3 + $0xa0] ss:$16 sps:$4 sm:$0xff]   ;;  %v1705_v40 = vld [vmem:[%s1901_s3 + $0xa8] ss:$16 sps:$4 sm:$0xff]   ;;  %vm521_vm0 = vcmask 785408  }
  0x29   : > { %s1241_s15 = sshll.u32 %s1910_s27, 2  ;;  %v1399_v41 = vld [vmem:[%s1900_s2 + $0x4] ss:$16 sps:$4 sm:$0xff]   ;;  %v1402_v42 = vld [vmem:[%s1900_s2 + $0xc] ss:$16 sps:$4 sm:$0xff]   ;;  %v1016_v4 = vshrl.u32 %v1015_v3, 7 }
  0x2a   : > { %s333_s8 = scalar_lea.vmem %s1898_s0, %s1241_s15  ;;  %s1698_s13 = scalar_lea.vmem %s1899_s1, %s1241_s15  ;;  %v1397_v43 = vld [vmem:[%s1900_s2] ss:$16 sps:$4 sm:$0xff]   ;;  %v1400_v45 = vld [vmem:[%s1900_s2 + $0x8] ss:$16 sps:$4 sm:$0xff]   ;;  %v1406_v46 = vld [vmem:[%s1900_s2 + $0x24] ss:$16 sps:$4 sm:$0xff]  }
  0x2b   : > { %530 = vmatpush1.bf16.msra.mxu0 %v1618_v27  ;;  %573 = vmatpush1.bf16.msra.mxu1 %v1623_v28  ;;  %v1403_v44 = vld [vmem:[%s333_s8] sm:$0xff]   ;;  %v1409_v47 = vld [vmem:[%s1900_s2 + $0x2c] ss:$16 sps:$4 sm:$0xff]   ;;  %v1407_v49 = vld [vmem:[%s1900_s2 + $0x28] ss:$16 sps:$4 sm:$0xff]   ;;  %v1017_v5 = vsub.s32 0, %v1016_v4 }
  0x2c   : > { %531 = vmatprep.subr.bf16.mxu0 %v1630_v29  ;;  %574 = vmatprep.subr.bf16.mxu1 %v1637_v30  ;;  %v1404_v48 = vld [vmem:[%s1900_s2 + $0x20] ss:$16 sps:$4 sm:$0xff]   ;;  %v1412_v50 = vld [vmem:[%s1900_s2 + $0x44] ss:$16 sps:$4 sm:$0xff]   ;;  %v1415_v51 = vld [vmem:[%s1900_s2 + $0x4c] ss:$16 sps:$4 sm:$0xff]  }
  0x2d   : > { %v1410_v52 = vld [vmem:[%s1900_s2 + $0x40] ss:$16 sps:$4 sm:$0xff]   ;;  %v1413_v53 = vld [vmem:[%s1900_s2 + $0x48] ss:$16 sps:$4 sm:$0xff]   ;;  %v1418_v54 = vld [vmem:[%s1900_s2 + $0x64] ss:$16 sps:$4 sm:$0xff]  }
  0x2e   : > { %v1421_v55 = vld [vmem:[%s1900_s2 + $0x6c] ss:$16 sps:$4 sm:$0xff]   ;;  %v1416_v56 = vld [vmem:[%s1900_s2 + $0x60] ss:$16 sps:$4 sm:$0xff]   ;;  %v1419_v57 = vld [vmem:[%s1900_s2 + $0x68] ss:$16 sps:$4 sm:$0xff]  }
  0x2f   : > { %532 = vmatpush1.bf16.msra.mxu0 %v1642_v31  ;;  %575 = vmatpush1.bf16.msra.mxu1 %v1649_v32  ;;  %v1424_v58 = vld [vmem:[%s1900_s2 + $0x84] ss:$16 sps:$4 sm:$0xff]   ;;  %v1427_v59 = vld [vmem:[%s1900_s2 + $0x8c] ss:$16 sps:$4 sm:$0xff]   ;;  %v1422_v60 = vld [vmem:[%s1900_s2 + $0x80] ss:$16 sps:$4 sm:$0xff]  }
  0x30   : > { %533 = vmatprep.subr.bf16.mxu0 %v1654_v33  ;;  %576 = vmatprep.subr.bf16.mxu1 %v1661_v34  ;;  %v1425_v61 = vld [vmem:[%s1900_s2 + $0x88] ss:$16 sps:$4 sm:$0xff]   ;;  %v1430_v62 = vld [vmem:[%s1900_s2 + $0xa4] ss:$16 sps:$4 sm:$0xff]   ;;  %v1433_v63 = vld [vmem:[%s1900_s2 + $0xac] ss:$16 sps:$4 sm:$0xff]  }
  0x31   : > { %v1428_v0 = vld [vmem:[%s1900_s2 + $0xa0] ss:$16 sps:$4 sm:$0xff]   ;;  %v1431_v1 = vld [vmem:[%s1900_s2 + $0xa8] ss:$16 sps:$4 sm:$0xff]   ;;  %v1025_v6 = vsub.s32 2, %v1016_v4  ;;  %v1021_v8 = vsub.s32 1, %v1016_v4 }
  0x32   : > { %v1434_v2 = vld [vmem:[%s1698_s13] sm:$0xff]   ;;  %s291_s13 = sand.u32 1, %s1449_s21   ;;  %v1029_v9 = vsub.s32 3, %v1016_v4  ;;  %s1311_s18 = sshll.u32 (%p1526_p5), %s1511_s24, 6 }
  0x33   : > { %534 = vmatpush1.bf16.msra.mxu0 %v1666_v35  ;;  %577 = vmatpush1.bf16.msra.mxu1 %v1671_v36  ;;  %s1823_s12 = sshll.u32 %s291_s13, 7  ;;  %v1013_v7 = vld [vmem:[%s1902_s4] sm:$0xf]  ;;  %s1101_s20 = scalar_lea.vmem (%p1526_p5), %s1904_s6, %s1311_s18 }
  0x34   : > { %535 = vmatprep.subr.bf16.mxu0 %v1678_v37  ;;  %578 = vmatprep.subr.bf16.mxu1 %v1685_v38  ;;  %v1018_v10 = vrot.slane %v1013_v7, %v1017_v5  ;;  %v1026_v11 = vrot.slane %v1013_v7, %v1025_v6  ;;  %v1022_v12 = vrot.slane %v1013_v7, %v1021_v8  ;;  %s1829_s17 = scalar_lea.vmem [#allocation2], %s1823_s12  ;;  %s1845_s21 = scalar_lea.vmem [#allocation3], %s1823_s12 }
  0x35   : > { %v1030_v13 = vrot.slane %v1013_v7, %v1029_v9  ;;  %v1043_v14 = vld [vmem:[%s1829_s17] sm:$0xff] }
  0x36   : > { %v1051_v15 = vld [vmem:[%s1829_s17 + $0x40] sm:$0xff] }
  0x37   : > { %536 = vmatpush1.bf16.msra.mxu0 %v1693_v39  ;;  %579 = vmatpush1.bf16.msra.mxu1 %v1705_v40 }
  0x38   : > { %731 = vmatprep.subr.bf16.mxu0 %v1399_v41  ;;  %774 = vmatprep.subr.bf16.mxu1 %v1402_v42 }
  0x3a   : > { %1269 = vmatmul.mubr.msk.bf16.vlgmr.msra.gmra.mrb[0].mxu0 %vm521_vm0, %v1403_v44  ;;  %1270 = vmatmul.mubr.msk.bf16.vlgmr.msra.gmra.mrb[0].mxu1 %vm521_vm0, %v1403_v44 }
  0x3b   : > { %732 = vmatpush1.bf16.msra.mxu0 %v1397_v43  ;;  %775 = vmatpush1.bf16.msra.mxu1 %v1400_v45 }
  0x3c   : > { %733 = vmatprep.subr.bf16.mxu0 %v1406_v46  ;;  %776 = vmatprep.subr.bf16.mxu1 %v1409_v47 }
  0x3d   : > { %763 = vmatprep.mubr.bf16.mxu0 %v1459_v18  ;;  %806 = vmatprep.mubr.bf16.mxu1 %v1459_v18 }
  0x3f   : > { %734 = vmatpush1.bf16.msra.mxu0 %v1404_v48  ;;  %777 = vmatpush1.bf16.msra.mxu1 %v1407_v49 }
  0x40   : > { %735 = vmatprep.subr.bf16.mxu0 %v1412_v50  ;;  %778 = vmatprep.subr.bf16.mxu1 %v1415_v51 }
  0x43   : > { %736 = vmatpush1.bf16.msra.mxu0 %v1410_v52  ;;  %779 = vmatpush1.bf16.msra.mxu1 %v1413_v53 }
  0x44   : > { %737 = vmatprep.subr.bf16.mxu0 %v1418_v54  ;;  %780 = vmatprep.subr.bf16.mxu1 %v1421_v55 }
  0x47   : > { %738 = vmatpush1.bf16.msra.mxu0 %v1416_v56  ;;  %781 = vmatpush1.bf16.msra.mxu1 %v1419_v57 }
  0x48   : > { %739 = vmatprep.subr.bf16.mxu0 %v1424_v58  ;;  %782 = vmatprep.subr.bf16.mxu1 %v1427_v59 }
  0x4b   : > { %740 = vmatpush1.bf16.msra.mxu0 %v1422_v60  ;;  %783 = vmatpush1.bf16.msra.mxu1 %v1425_v61 }
  0x4c   : > { %741 = vmatprep.subr.bf16.mxu0 %v1430_v62  ;;  %784 = vmatprep.subr.bf16.mxu1 %v1433_v63 }
  0x4f   : > { %742 = vmatpush1.bf16.msra.mxu0 %v1428_v0  ;;  %785 = vmatpush1.bf16.msra.mxu1 %v1431_v1 }
  0x50   : > { %825 = vmatprep.subr.bf16.mxu0 %v1399_v41  ;;  %868 = vmatprep.subr.bf16.mxu1 %v1402_v42 }
  0x52   : > { %1295 = vmatmul.mubr.msk.bf16.vlgmr.msra.gmra.mrb[0].mxu0 %vm521_vm0, %v1403_v44  ;;  %1296 = vmatmul.mubr.msk.bf16.vlgmr.msra.gmra.mrb[0].mxu1 %vm521_vm0, %v1403_v44  ;;  %v1049_v44 = vld [vmem:[%s1829_s17 + $0x30] sm:$0xff] }
  0x53   : > { %826 = vmatpush1.bf16.msra.mxu0 %v1397_v43  ;;  %869 = vmatpush1.bf16.msra.mxu1 %v1400_v45  ;;  %v1057_v45 = vld [vmem:[%s1829_s17 + $0x70] sm:$0xff] }
  0x54   : > { %827 = vmatprep.subr.bf16.mxu0 %v1406_v46  ;;  %870 = vmatprep.subr.bf16.mxu1 %v1409_v47  ;;  %v1048_v46 = vld [vmem:[%s1829_s17 + $0x28] sm:$0xff] }
  0x55   : > { %857 = vmatprep.mubr.bf16.mxu0 %v1459_v18  ;;  %900 = vmatprep.mubr.bf16.mxu1 %v1459_v18 }
  0x57   : > { %828 = vmatpush1.bf16.msra.mxu0 %v1404_v48  ;;  %871 = vmatpush1.bf16.msra.mxu1 %v1407_v49 }
  0x58   : > { %829 = vmatprep.subr.bf16.mxu0 %v1412_v50  ;;  %872 = vmatprep.subr.bf16.mxu1 %v1415_v51  ;;  %v1056_v50 = vld [vmem:[%s1829_s17 + $0x68] sm:$0xff] }
  0x5b   : > { %830 = vmatpush1.bf16.msra.mxu0 %v1410_v52  ;;  %873 = vmatpush1.bf16.msra.mxu1 %v1413_v53  ;;  %v1050_v52 = vld [vmem:[%s1829_s17 + $0x38] sm:$0xff] }
  0x5c   : > { %831 = vmatprep.subr.bf16.mxu0 %v1418_v54  ;;  %874 = vmatprep.subr.bf16.mxu1 %v1421_v55  ;;  %v1058_v53 = vld [vmem:[%s1829_s17 + $0x78] sm:$0xff] }
  0x5f   : > { %832 = vmatpush1.bf16.msra.mxu0 %v1416_v56  ;;  %875 = vmatpush1.bf16.msra.mxu1 %v1419_v57 }
  0x60   : > { %833 = vmatprep.subr.bf16.mxu0 %v1424_v58  ;;  %876 = vmatprep.subr.bf16.mxu1 %v1427_v59 }
  0x63   : > { %834 = vmatpush1.bf16.msra.mxu0 %v1422_v60  ;;  %877 = vmatpush1.bf16.msra.mxu1 %v1425_v61 }
  0x64   : > { %835 = vmatprep.subr.bf16.mxu0 %v1430_v62  ;;  %878 = vmatprep.subr.bf16.mxu1 %v1433_v63 }
  0x67   : > { %836 = vmatpush1.bf16.msra.mxu0 %v1428_v0  ;;  %879 = vmatpush1.bf16.msra.mxu1 %v1431_v1 }
  0x68   : > { %919 = vmatprep.subr.bf16.mxu0 %v1559_v16  ;;  %962 = vmatprep.subr.bf16.mxu1 %v1564_v17 }
  0x6a   : > { %1298 = vmatmul.mubr.msk.bf16.vlgmr.msra.gmra.mrb[0].mxu0 %vm521_vm0, %v1434_v2  ;;  %1299 = vmatmul.mubr.msk.bf16.vlgmr.msra.gmra.mrb[0].mxu1 %vm521_vm0, %v1434_v2 }
  0x6b   : > { %920 = vmatpush1.bf16.msra.mxu0 %v1572_v19  ;;  %963 = vmatpush1.bf16.msra.mxu1 %v1577_v20  ;;  %v1053_v19 = vld [vmem:[%s1829_s17 + $0x50] sm:$0xff]  ;;  %v1044_v20 = vld [vmem:[%s1829_s17 + $0x8] sm:$0xff] }
  0x6c   : > { %921 = vmatprep.subr.bf16.mxu0 %v1583_v21  ;;  %964 = vmatprep.subr.bf16.mxu1 %v1591_v22 }
  0x6d   : > { %951 = vmatprep.mubr.bf16.mxu0 %v1459_v18  ;;  %994 = vmatprep.mubr.bf16.mxu1 %v1459_v18  ;;  %v1045_v18 = vld [vmem:[%s1829_s17 + $0x10] sm:$0xff] }
  0x6f   : > { %922 = vmatpush1.bf16.msra.mxu0 %v1596_v23  ;;  %965 = vmatpush1.bf16.msra.mxu1 %v1602_v24  ;;  %v1052_v24 = vld [vmem:[%s1829_s17 + $0x48] sm:$0xff] }
  0x70   : > { %923 = vmatprep.subr.bf16.mxu0 %v1608_v25  ;;  %966 = vmatprep.subr.bf16.mxu1 %v1613_v26  ;;  %v1046_v26 = vld [vmem:[%s1829_s17 + $0x18] sm:$0xff] }
  0x73   : > { %924 = vmatpush1.bf16.msra.mxu0 %v1618_v27  ;;  %967 = vmatpush1.bf16.msra.mxu1 %v1623_v28  ;;  %v1054_v27 = vld [vmem:[%s1829_s17 + $0x58] sm:$0xff] }
  0x74   : > { %925 = vmatprep.subr.bf16.mxu0 %v1630_v29  ;;  %968 = vmatprep.subr.bf16.mxu1 %v1637_v30 }
  0x77   : > { %926 = vmatpush1.bf16.msra.mxu0 %v1642_v31  ;;  %969 = vmatpush1.bf16.msra.mxu1 %v1649_v32 }
  0x78   : > { %927 = vmatprep.subr.bf16.mxu0 %v1654_v33  ;;  %970 = vmatprep.subr.bf16.mxu1 %v1661_v34 }
  0x7b   : > { %928 = vmatpush1.bf16.msra.mxu0 %v1666_v35  ;;  %971 = vmatpush1.bf16.msra.mxu1 %v1671_v36  ;;  %v1047_v36 = vld [vmem:[%s1829_s17 + $0x20] sm:$0xff] }
  0x7c   : > { %929 = vmatprep.subr.bf16.mxu0 %v1678_v37  ;;  %972 = vmatprep.subr.bf16.mxu1 %v1685_v38  ;;  %v1055_v37 = vld [vmem:[%s1829_s17 + $0x60] sm:$0xff] }
  0x7f   : > { %930 = vmatpush1.bf16.msra.mxu0 %v1693_v39  ;;  %973 = vmatpush1.bf16.msra.mxu1 %v1705_v40 }
  0x82   : > { %1300 = vmatmul.mubr.msk.bf16.vlgmr.msra.gmra.mrb[0].mxu0 %vm521_vm0, %v1434_v2  ;;  %1301 = vmatmul.mubr.msk.bf16.vlgmr.msra.gmra.mrb[0].mxu1 %vm521_vm0, %v1434_v2 }
 0x155   : > { %v953_v16 = vpop.f32.mrb[0].mxu0  ;;  %v996_v17 = vpop.f32.mrb[0].mxu1 }
 0x156   : > { %v1035_v21 = vadd.f32 %v1018_v10, %v953_v16  ;;  %v1037_v22 = vadd.f32 %v1026_v11, %v996_v17  ;;  %v955_v23 = vpop.f32.mrb[1].mxu0  ;;  %v998_v25 = vpop.f32.mrb[1].mxu1 }
 0x157   : > { %v1036_v28 = vadd.f32 %v1022_v12, %v955_v23  ;;  %v1038_v29 = vadd.f32 %v1030_v13, %v998_v25  ;;  %v957_v30 = vpop.f32.mrb[2].mxu0  ;;  %v1000_v31 = vpop.f32.mrb[2].mxu1 }
 0x158   : > { %v1059_v32 = vadd.f32 %v1043_v14, %v1035_v21  ;;  %v1067_v33 = vadd.f32 %v1051_v15, %v1035_v21  ;;  %v1061_v34 = vadd.f32 %v1045_v18, %v1037_v22  ;;  %v1069_v35 = vadd.f32 %v1053_v19, %v1037_v22  ;;  %v959_v38 = vpop.f32.mrb[3].mxu0  ;;  %v1002_v39 = vpop.f32.mrb[3].mxu1 }
 0x159   : > { %v1060_v40 = vadd.f32 %v1044_v20, %v1036_v28  ;;  %v1068_v41 = vadd.f32 %v1052_v24, %v1036_v28  ;;  %v1062_v42 = vadd.f32 %v1046_v26, %v1038_v29  ;;  %v1070_v43 = vadd.f32 %v1054_v27, %v1038_v29 }
 0x15a   : > { %1075 = vst [vmem:[%s1845_s21] sm:$0xff] %v1059_v32  ;;  %1083 = vst [vmem:[%s1845_s21 + $0x40] sm:$0xff] %v1067_v33  ;;  %v1039_v47 = vadd.f32 %v1018_v10, %v957_v30  ;;  %v1041_v48 = vadd.f32 %v1026_v11, %v1000_v31  ;;  %v1040_v49 = vadd.f32 %v1022_v12, %v959_v38 }
 0x15b   : > { %1077 = vst [vmem:[%s1845_s21 + $0x10] sm:$0xff] %v1061_v34  ;;  %1085 = vst [vmem:[%s1845_s21 + $0x50] sm:$0xff] %v1069_v35  ;;  %v1042_v51 = vadd.f32 %v1030_v13, %v1002_v39  ;;  %1097 = sbr.rel (!%p1526_p5) target bundleno = 363 (0x16b), region = 71 }
 0x15c   : > { %1076 = vst [vmem:[%s1845_s21 + $0x8] sm:$0xff] %v1060_v40  ;;  %1084 = vst [vmem:[%s1845_s21 + $0x48] sm:$0xff] %v1068_v41  ;;  %v1063_v54 = vadd.f32 %v1047_v36, %v1039_v47  ;;  %v1071_v55 = vadd.f32 %v1055_v37, %v1039_v47  ;;  %v1065_v56 = vadd.f32 %v1049_v44, %v1041_v48 }
 0x15d   : > { %1078 = vst [vmem:[%s1845_s21 + $0x18] sm:$0xff] %v1062_v42  ;;  %1086 = vst [vmem:[%s1845_s21 + $0x58] sm:$0xff] %v1070_v43  ;;  %v1073_v57 = vadd.f32 %v1057_v45, %v1041_v48  ;;  %v1064_v58 = vadd.f32 %v1048_v46, %v1040_v49  ;;  %v1072_v59 = vadd.f32 %v1056_v50, %v1040_v49 }
 0x15e   : > { %v1066_v60 = vadd.f32 %v1050_v52, %v1042_v51  ;;  %v1074_v61 = vadd.f32 %v1058_v53, %v1042_v51  ;;  %1079 = vst [vmem:[%s1845_s21 + $0x20] sm:$0xff] %v1063_v54  ;;  %1087 = vst [vmem:[%s1845_s21 + $0x60] sm:$0xff] %v1071_v55 }
 0x15f   : > { %1081 = vst [vmem:[%s1845_s21 + $0x30] sm:$0xff] %v1065_v56  ;;  %1089 = vst [vmem:[%s1845_s21 + $0x70] sm:$0xff] %v1073_v57 }
 0x160   : > { %1080 = vst [vmem:[%s1845_s21 + $0x28] sm:$0xff] %v1064_v58  ;;  %1088 = vst [vmem:[%s1845_s21 + $0x68] sm:$0xff] %v1072_v59 }
 0x161   : > { %1082 = vst [vmem:[%s1845_s21 + $0x38] sm:$0xff] %v1066_v60  ;;  %1090 = vst [vmem:[%s1845_s21 + $0x78] sm:$0xff] %v1074_v61  ;;  %v1114_v62 = vld [vmem:[%s1845_s21] sm:$0xff] (%p1526_p5) }
 0x162   : > { %v1118_v0 = vld [vmem:[%s1845_s21 + $0x10] sm:$0xff]  ;;  %1115 = vst [vmem:[%s1101_s20] sm:$0xff] %v1114_v62  ;;  %v1130_v6 = vld [vmem:[%s1845_s21 + $0x40] sm:$0xff] }
 0x163   : > { %v1116_v63 = vld [vmem:[%s1845_s21 + $0x8] sm:$0xff]  ;;  %1119 = vst [vmem:[%s1101_s20 + $0x10] sm:$0xff] %v1118_v0  ;;  %1131 = vst [vmem:[%s1101_s20 + $0x200] sm:$0xff] %v1130_v6  ;;  %v1134_v8 = vld [vmem:[%s1845_s21 + $0x50] sm:$0xff] }
 0x164   : > { %v1120_v1 = vld [vmem:[%s1845_s21 + $0x18] sm:$0xff]  ;;  %1117 = vst [vmem:[%s1101_s20 + $0x8] sm:$0xff] %v1116_v63  ;;  %v1132_v7 = vld [vmem:[%s1845_s21 + $0x48] sm:$0xff]  ;;  %1135 = vst [vmem:[%s1101_s20 + $0x210] sm:$0xff] %v1134_v8 }
 0x165   : > { %v1122_v2 = vld [vmem:[%s1845_s21 + $0x20] sm:$0xff]  ;;  %1121 = vst [vmem:[%s1101_s20 + $0x18] sm:$0xff] %v1120_v1  ;;  %v1136_v9 = vld [vmem:[%s1845_s21 + $0x58] sm:$0xff]  ;;  %1133 = vst [vmem:[%s1101_s20 + $0x208] sm:$0xff] %v1132_v7 }
 0x166   : > { %1123 = vst [vmem:[%s1101_s20 + $0x20] sm:$0xff] %v1122_v2  ;;  %v1126_v4 = vld [vmem:[%s1845_s21 + $0x30] sm:$0xff]  ;;  %1137 = vst [vmem:[%s1101_s20 + $0x218] sm:$0xff] %v1136_v9  ;;  %v1138_v10 = vld [vmem:[%s1845_s21 + $0x60] sm:$0xff] }
 0x167   : > { %v1124_v3 = vld [vmem:[%s1845_s21 + $0x28] sm:$0xff]  ;;  %1127 = vst [vmem:[%s1101_s20 + $0x30] sm:$0xff] %v1126_v4  ;;  %v1142_v12 = vld [vmem:[%s1845_s21 + $0x70] sm:$0xff]  ;;  %1139 = vst [vmem:[%s1101_s20 + $0x220] sm:$0xff] %v1138_v10 }
 0x168   : > { %1125 = vst [vmem:[%s1101_s20 + $0x28] sm:$0xff] %v1124_v3  ;;  %v1128_v5 = vld [vmem:[%s1845_s21 + $0x38] sm:$0xff]  ;;  %v1140_v11 = vld [vmem:[%s1845_s21 + $0x68] sm:$0xff]  ;;  %1143 = vst [vmem:[%s1101_s20 + $0x230] sm:$0xff] %v1142_v12 }
 0x169   : > { %1129 = vst [vmem:[%s1101_s20 + $0x38] sm:$0xff] %v1128_v5  ;;  %1141 = vst [vmem:[%s1101_s20 + $0x228] sm:$0xff] %v1140_v11  ;;  %v1144_v13 = vld [vmem:[%s1845_s21 + $0x78] sm:$0xff] }
 0x16a   : > { %1145 = vst [vmem:[%s1101_s20 + $0x238] sm:$0xff] %v1144_v13 }
 0x16b PF: > { %p13_p11 = scmp.ge.s32.totalorder %s1514_s25, 10   ;;  %s1906_s21 = smov %s1453_s22 }
 0x16c   : > { %s1907_s22 = smov %s1524_s28  ;;  %s1908_s23 = smov %s1514_s25 }
 0x16d   :  { %15 = sbr.rel (!%p13_p11) target bundleno = 2 (0x2), region = 131 }

</bundles_post_ra>
